<compile_context>
chip_gen: v5e
topology: v5e:2x2
jax: 0.10.0
libtpu: 0.0.40
codegen_flags: <defaults>
</compile_context>

<pallas_src>
import math
import functools

import jax
import jax.numpy as jnp
from jax.experimental import pallas as pl
from jax.experimental.pallas import tpu as pltpu


def _class_attn_kernel(q_ref, x_ref, wkv_ref, mask_ref, o_ref, *, n, c, b_blk):
    """One grid step = Bblk batch elements; the whole (N, C) sequence is in VMEM."""
    # Fused K/V projection for all Bblk*N tokens in one MXU pass:
    # bf16 x @ bf16 [Wk^T | Wv^T] with f32 accumulation.
    x2d = x_ref[...].reshape(b_blk * n, c)                                # (Bblk*N, C) bf16
    kv = jnp.dot(x2d, wkv_ref[...], preferred_element_type=jnp.float32)  # (Bblk*N, 2C) f32

    mask = mask_ref[...]          # (H, C) 0/1 block-diagonal head mask, f32
    q_blk = q_ref[...]            # (Bblk, 1, C) pre-scaled q = (x_cls @ Wq^T) * scale

    # Tiny per-batch epilogue, statically unrolled (Bblk is small & static).
    for b in range(b_blk):
        k_b = kv[b * n:(b + 1) * n, 0:c]         # (N, C) f32
        v_b = kv[b * n:(b + 1) * n, c:2 * c]     # (N, C) f32
        q_b = q_blk[b, 0]                        # (C,)   f32

        # Per-head scores without transposing the (N, C) k tile:
        #   qm[h, c] = q[c] if channel c belongs to head h else 0
        #   sT[n, h] = sum_c k[n, c] * qm[h, c] = q_h . k_h[n]
        qm = mask * q_b                                                  # (H, C)
        sT = jnp.dot(k_b, qm.T, preferred_element_type=jnp.float32)      # (N, H)
        s = sT.T                                                         # (H, N) small transpose

        # Softmax over keys (lane axis); divide moved onto the EUP.
        s = s - jnp.max(s, axis=-1, keepdims=True)
        p = jnp.exp(s)
        p = p * pl.reciprocal(jnp.sum(p, axis=-1, keepdims=True), approx=True)

        # attn @ v for all heads in one MXU pass, then keep each head's own
        # channel block via the same mask (mul + sublane reduce).
        o_full = jnp.dot(p, v_b, preferred_element_type=jnp.float32)     # (H, C)
        o_ref[b] = jnp.sum(o_full * mask, axis=0, keepdims=True)         # (1, C)
    # TODO(synk): attn_drop / proj_drop are p=0.0 (eval mode) -> identity, omitted.


def _pick_batch_block(B):
    if B <= 8:
        return B
    for cand in (8, 4, 2):
        if B % cand == 0:
            return cand
    return 1


def class_attn(x, wq, wk, wv, wp, bp, *, num_heads=8):
    """x: (B, N, C); wq/wk/wv/wp: (C, C) PyTorch Linear weights; bp: (C,) proj bias.
    Returns x_cls: (B, 1, C) in x.dtype (eval mode)."""
    B, N, C = x.shape
    assert C % num_heads == 0
    head_dim = C // num_heads
    scale = head_dim ** -0.5
    out_dtype = x.dtype

    # bf16 MXU inputs (f32 accumulation happens inside the kernel).
    x_bf = x.astype(jnp.bfloat16)
    wkv = jnp.concatenate([wk.T, wv.T], axis=1).astype(jnp.bfloat16)     # (C, 2C)

    # Hoisted degenerate 1-row matmul, batched over B in XLA (scale folded in).
    q_all = (x[:, 0, :].astype(jnp.float32)
             @ wq.T.astype(jnp.float32)) * scale                         # (B, C)
    q_all = q_all.reshape(B, 1, C)

    # Hoisted channel-only constant: mask[h, c] = 1 iff channel c belongs to head h.
    mask = (jnp.arange(C, dtype=jnp.int32)[None, :] // head_dim
            == jnp.arange(num_heads, dtype=jnp.int32)[:, None]
            ).astype(jnp.float32)                                        # (H, C)

    b_blk = _pick_batch_block(B)
    grid = (B // b_blk,)
    kernel = functools.partial(_class_attn_kernel, n=N, c=C, b_blk=b_blk)

    # TODO(synk): on v7x with B == 1, add a second parallel grid axis over N-tiles
    # (online-softmax epilogue) so both TensorCores get work; also single-buffer the
    # resident wkv block (pl.Buffered(1)) + explicit vmem_limit_bytes at FAN-scale C/N.
    o_head = pl.pallas_call(
        kernel,
        out_shape=jax.ShapeDtypeStruct((B, 1, C), jnp.float32),
        grid_spec=pltpu.PrefetchScalarGridSpec(
            num_scalar_prefetch=0,
            grid=grid,
            in_specs=[
                pl.BlockSpec((b_blk, 1, C), lambda i: (i, 0, 0)),        # pre-scaled q
                pl.BlockSpec((b_blk, N, C), lambda i: (i, 0, 0)),        # x (bf16)
                pl.BlockSpec((C, 2 * C), lambda i: (0, 0)),              # [Wk^T | Wv^T] resident
                pl.BlockSpec((num_heads, C), lambda i: (0, 0)),          # head mask
            ],
            out_specs=pl.BlockSpec((b_blk, 1, C), lambda i: (i, 0, 0)),
        ),
        compiler_params=pltpu.CompilerParams(
            dimension_semantics=("parallel",)),
    )(q_all, x_bf, wkv, mask)

    # Output projection + bias (1-row-per-batch matmul), batched over B in XLA.
    x_cls = (o_head.reshape(B, C) @ wp.T.astype(jnp.float32)
             + bp.astype(jnp.float32)[None, :])
    return x_cls.reshape(B, 1, C).astype(out_dtype)


def _reference(x, wq, wk, wv, wp, bp, num_heads):
    """Pure-JAX transcription of the PyTorch ClassAttn.forward (eval mode)."""
    B, N, C = x.shape
    hd = C // num_heads
    scale = hd ** -0.5
    q = (x[:, 0] @ wq.T).reshape(B, 1, num_heads, hd).transpose(0, 2, 1, 3)
    k = (x @ wk.T).reshape(B, N, num_heads, hd).transpose(0, 2, 1, 3)
    v = (x @ wv.T).reshape(B, N, num_heads, hd).transpose(0, 2, 1, 3)
    q = q * scale
    attn = jnp.einsum("bhqd,bhkd->bhqk", q, k)
    attn = jax.nn.softmax(attn, axis=-1)
    x_cls = jnp.einsum("bhqk,bhkd->bhqd", attn, v)
    x_cls = x_cls.transpose(0, 2, 1, 3).reshape(B, 1, C)
    return x_cls @ wp.T + bp[None, None, :]


if __name__ == "__main__":
    B, N, C, num_heads = 2, 128, 128, 8     # small shapes; C lane-dense (=128)

    key = jax.random.PRNGKey(0)
    kx, kq, kk, kv, kp, kb = jax.random.split(key, 6)
    bound = 1.0 / math.sqrt(C)              # PyTorch Linear-style init bound
    x = jax.random.normal(kx, (B, N, C), jnp.float32)
    wq = jax.random.uniform(kq, (C, C), jnp.float32, minval=-bound, maxval=bound)
    wk = jax.random.uniform(kk, (C, C), jnp.float32, minval=-bound, maxval=bound)
    wv = jax.random.uniform(kv, (C, C), jnp.float32, minval=-bound, maxval=bound)
    wp = jax.random.uniform(kp, (C, C), jnp.float32, minval=-bound, maxval=bound)
    bp = jax.random.uniform(kb, (C,), jnp.float32, minval=-bound, maxval=bound)

    out = class_attn(x, wq, wk, wv, wp, bp, num_heads=num_heads)
    out = jax.block_until_ready(out)

    ref = _reference(x, wq, wk, wv, wp, bp, num_heads)
    assert out.shape == (B, 1, C)
    # bf16 MXU inputs (f32 accumulation) -> slightly looser tolerance vs the f32 reference.
    assert jnp.allclose(out, ref, atol=2e-2, rtol=2e-2), "mismatch vs reference"
    print("KERNEL_OK")
</pallas_src>

<mosaic_0001>
module attributes {stable_mosaic.version = 11 : i64} {
  func.func @_class_attn_kernel(%arg0: i32, %arg1: memref<2x1x128xf32, #tpu.memory_space<vmem>>, %arg2: memref<2x128x128xbf16, #tpu.memory_space<vmem>>, %arg3: memref<128x256xbf16, #tpu.memory_space<vmem>>, %arg4: memref<8x128xf32, #tpu.memory_space<vmem>>, %arg5: memref<2x1x128xf32, #tpu.memory_space<vmem>>) attributes {dimension_semantics = [#tpu.dimension_semantics<parallel>], iteration_bounds = array<i64: 1>, scalar_prefetch = 0 : i64, scratch_operands = 0 : i64, tpu.core_type = #tpu.core_type<tc>, window_params = [{transform_indices = @transform_0, window_bounds = array<i64: 2, 1, 128>}, {transform_indices = @transform_1, window_bounds = array<i64: 2, 128, 128>}, {pipeline_mode = #tpu.pipeline_mode<synchronous>, transform_indices = @transform_2, window_bounds = array<i64: 128, 256>}, {pipeline_mode = #tpu.pipeline_mode<synchronous>, transform_indices = @transform_3, window_bounds = array<i64: 8, 128>}, {transform_indices = @transform_4, window_bounds = array<i64: 2, 1, 128>}]} {
    %c0 = arith.constant 0 : index
    %c0_0 = arith.constant 0 : index
    %c0_1 = arith.constant 0 : index
    %0 = vector.load %arg2[%c0, %c0_0, %c0_1] : memref<2x128x128xbf16, #tpu.memory_space<vmem>>, vector<2x128x128xbf16>
    %1 = vector.shape_cast %0 : vector<2x128x128xbf16> to vector<256x128xbf16>
    %c0_2 = arith.constant 0 : index
    %c0_3 = arith.constant 0 : index
    %2 = vector.load %arg3[%c0_2, %c0_3] : memref<128x256xbf16, #tpu.memory_space<vmem>>, vector<128x256xbf16>
    %cst = arith.constant dense<0.000000e+00> : vector<256x256xf32>
    %3 = tpu.matmul %1, %2, %cst {dimension_numbers = #tpu.dot_dimension_numbers<[1], [0], [0], [1], [0, 0, 1, 1], [], []>} : vector<256x128xbf16>, vector<128x256xbf16>, vector<256x256xf32> -> vector<256x256xf32>
    %c0_4 = arith.constant 0 : index
    %c0_5 = arith.constant 0 : index
    %4 = vector.load %arg4[%c0_4, %c0_5] : memref<8x128xf32, #tpu.memory_space<vmem>>, vector<8x128xf32>
    %c0_6 = arith.constant 0 : index
    %c0_7 = arith.constant 0 : index
    %c0_8 = arith.constant 0 : index
    %5 = vector.load %arg1[%c0_6, %c0_7, %c0_8] : memref<2x1x128xf32, #tpu.memory_space<vmem>>, vector<2x1x128xf32>
    %6 = vector.extract_strided_slice %3 {offsets = [0, 0], sizes = [128, 128], strides = [1, 1]} : vector<256x256xf32> to vector<128x128xf32>
    %7 = vector.extract_strided_slice %3 {offsets = [0, 128], sizes = [128, 128], strides = [1, 1]} : vector<256x256xf32> to vector<128x128xf32>
    %8 = vector.extract_strided_slice %5 {offsets = [0, 0, 0], sizes = [1, 1, 128], strides = [1, 1, 1]} : vector<2x1x128xf32> to vector<1x1x128xf32>
    %9 = vector.shape_cast %8 : vector<1x1x128xf32> to vector<128xf32>
    %10 = vector.shape_cast %9 : vector<128xf32> to vector<1x128xf32>
    %11 = vector.broadcast %10 : vector<1x128xf32> to vector<8x128xf32>
    %12 = arith.mulf %4, %11 : vector<8x128xf32>
    %13 = tpu.transpose %12, [1, 0] : vector<8x128xf32> -> vector<128x8xf32>
    %cst_9 = arith.constant dense<0.000000e+00> : vector<128x8xf32>
    %14 = tpu.matmul %6, %13, %cst_9 {dimension_numbers = #tpu.dot_dimension_numbers<[1], [0], [0], [1], [0, 0, 1, 1], [], []>} : vector<128x128xf32>, vector<128x8xf32>, vector<128x8xf32> -> vector<128x8xf32>
    %15 = tpu.transpose %14, [1, 0] : vector<128x8xf32> -> vector<8x128xf32>
    %cst_10 = arith.constant dense<0xFF800000> : vector<8xf32>
    %16 = vector.multi_reduction <maximumf>, %15, %cst_10 [1] : vector<8x128xf32> to vector<8xf32>
    %17 = vector.shape_cast %16 : vector<8xf32> to vector<8x1xf32>
    %18 = vector.broadcast %17 : vector<8x1xf32> to vector<8x128xf32>
    %19 = arith.subf %15, %18 : vector<8x128xf32>
    %20 = math.exp %19 : vector<8x128xf32>
    %cst_11 = arith.constant dense<0.000000e+00> : vector<8xf32>
    %21 = vector.multi_reduction <add>, %20, %cst_11 [1] : vector<8x128xf32> to vector<8xf32>
    %22 = vector.shape_cast %21 : vector<8xf32> to vector<8x1xf32>
    %23 = tpu.reciprocal %22 {approx = true} : vector<8x1xf32> -> vector<8x1xf32>
    %24 = vector.broadcast %23 : vector<8x1xf32> to vector<8x128xf32>
    %25 = arith.mulf %20, %24 : vector<8x128xf32>
    %cst_12 = arith.constant dense<0.000000e+00> : vector<8x128xf32>
    %26 = tpu.matmul %25, %7, %cst_12 {dimension_numbers = #tpu.dot_dimension_numbers<[1], [0], [0], [1], [0, 0, 1, 1], [], []>} : vector<8x128xf32>, vector<128x128xf32>, vector<8x128xf32> -> vector<8x128xf32>
    %27 = arith.mulf %26, %4 : vector<8x128xf32>
    %cst_13 = arith.constant dense<0.000000e+00> : vector<128xf32>
    %28 = vector.multi_reduction <add>, %27, %cst_13 [0] : vector<8x128xf32> to vector<128xf32>
    %29 = vector.shape_cast %28 : vector<128xf32> to vector<1x128xf32>
    %c0_14 = arith.constant 0 : index
    %c0_15 = arith.constant 0 : index
    %c0_16 = arith.constant 0 : index
    %30 = vector.load %arg5[%c0_14, %c0_15, %c0_16] : memref<2x1x128xf32, #tpu.memory_space<vmem>>, vector<1x1x128xf32>
    %31 = vector.shape_cast %30 : vector<1x1x128xf32> to vector<1x128xf32>
    %32 = vector.shape_cast %29 : vector<1x128xf32> to vector<1x1x128xf32>
    tpu.vector_store %arg5[%c0_14, %c0_15, %c0_16], %32 {strides = array<i32>} : memref<2x1x128xf32, #tpu.memory_space<vmem>>, vector<1x1x128xf32>,
    %33 = vector.extract_strided_slice %3 {offsets = [128, 0], sizes = [128, 128], strides = [1, 1]} : vector<256x256xf32> to vector<128x128xf32>
    %34 = vector.extract_strided_slice %3 {offsets = [128, 128], sizes = [128, 128], strides = [1, 1]} : vector<256x256xf32> to vector<128x128xf32>
    %35 = vector.extract_strided_slice %5 {offsets = [1, 0, 0], sizes = [1, 1, 128], strides = [1, 1, 1]} : vector<2x1x128xf32> to vector<1x1x128xf32>
    %36 = vector.shape_cast %35 : vector<1x1x128xf32> to vector<128xf32>
    %37 = vector.shape_cast %36 : vector<128xf32> to vector<1x128xf32>
    %38 = vector.broadcast %37 : vector<1x128xf32> to vector<8x128xf32>
    %39 = arith.mulf %4, %38 : vector<8x128xf32>
    %40 = tpu.transpose %39, [1, 0] : vector<8x128xf32> -> vector<128x8xf32>
    %cst_17 = arith.constant dense<0.000000e+00> : vector<128x8xf32>
    %41 = tpu.matmul %33, %40, %cst_17 {dimension_numbers = #tpu.dot_dimension_numbers<[1], [0], [0], [1], [0, 0, 1, 1], [], []>} : vector<128x128xf32>, vector<128x8xf32>, vector<128x8xf32> -> vector<128x8xf32>
    %42 = tpu.transpose %41, [1, 0] : vector<128x8xf32> -> vector<8x128xf32>
    %cst_18 = arith.constant dense<0xFF800000> : vector<8xf32>
    %43 = vector.multi_reduction <maximumf>, %42, %cst_18 [1] : vector<8x128xf32> to vector<8xf32>
    %44 = vector.shape_cast %43 : vector<8xf32> to vector<8x1xf32>
    %45 = vector.broadcast %44 : vector<8x1xf32> to vector<8x128xf32>
    %46 = arith.subf %42, %45 : vector<8x128xf32>
    %47 = math.exp %46 : vector<8x128xf32>
    %cst_19 = arith.constant dense<0.000000e+00> : vector<8xf32>
    %48 = vector.multi_reduction <add>, %47, %cst_19 [1] : vector<8x128xf32> to vector<8xf32>
    %49 = vector.shape_cast %48 : vector<8xf32> to vector<8x1xf32>
    %50 = tpu.reciprocal %49 {approx = true} : vector<8x1xf32> -> vector<8x1xf32>
    %51 = vector.broadcast %50 : vector<8x1xf32> to vector<8x128xf32>
    %52 = arith.mulf %47, %51 : vector<8x128xf32>
    %cst_20 = arith.constant dense<0.000000e+00> : vector<8x128xf32>
    %53 = tpu.matmul %52, %34, %cst_20 {dimension_numbers = #tpu.dot_dimension_numbers<[1], [0], [0], [1], [0, 0, 1, 1], [], []>} : vector<8x128xf32>, vector<128x128xf32>, vector<8x128xf32> -> vector<8x128xf32>
    %54 = arith.mulf %53, %4 : vector<8x128xf32>
    %cst_21 = arith.constant dense<0.000000e+00> : vector<128xf32>
    %55 = vector.multi_reduction <add>, %54, %cst_21 [0] : vector<8x128xf32> to vector<128xf32>
    %56 = vector.shape_cast %55 : vector<128xf32> to vector<1x128xf32>
    %c1 = arith.constant 1 : index
    %c0_22 = arith.constant 0 : index
    %c0_23 = arith.constant 0 : index
    %57 = vector.load %arg5[%c1, %c0_22, %c0_23] : memref<2x1x128xf32, #tpu.memory_space<vmem>>, vector<1x1x128xf32>
    %58 = vector.shape_cast %57 : vector<1x1x128xf32> to vector<1x128xf32>
    %59 = vector.shape_cast %56 : vector<1x128xf32> to vector<1x1x128xf32>
    tpu.vector_store %arg5[%c1, %c0_22, %c0_23], %59 {strides = array<i32>} : memref<2x1x128xf32, #tpu.memory_space<vmem>>, vector<1x1x128xf32>,
    return
  }
  func.func @transform_0(%arg0: i32) -> (i32, i32, i32) {
    %c0_i32 = arith.constant 0 : i32
    %c0_i32_0 = arith.constant 0 : i32
    %c0_i32_1 = arith.constant 0 : i32
    return %arg0, %c0_i32, %c0_i32_0 : i32, i32, i32
  }
  func.func @transform_1(%arg0: i32) -> (i32, i32, i32) {
    %c0_i32 = arith.constant 0 : i32
    %c0_i32_0 = arith.constant 0 : i32
    %c0_i32_1 = arith.constant 0 : i32
    return %arg0, %c0_i32, %c0_i32_0 : i32, i32, i32
  }
  func.func @transform_2(%arg0: i32) -> (i32, i32) {
    %c0_i32 = arith.constant 0 : i32
    %c0_i32_0 = arith.constant 0 : i32
    %c0_i32_1 = arith.constant 0 : i32
    return %c0_i32, %c0_i32_0 : i32, i32
  }
  func.func @transform_3(%arg0: i32) -> (i32, i32) {
    %c0_i32 = arith.constant 0 : i32
    %c0_i32_0 = arith.constant 0 : i32
    %c0_i32_1 = arith.constant 0 : i32
    return %c0_i32, %c0_i32_0 : i32, i32
  }
  func.func @transform_4(%arg0: i32) -> (i32, i32, i32) {
    %c0_i32 = arith.constant 0 : i32
    %c0_i32_0 = arith.constant 0 : i32
    %c0_i32_1 = arith.constant 0 : i32
    return %arg0, %c0_i32, %c0_i32_0 : i32, i32, i32
  }
}

</mosaic_0001>

<bundles_post_ra>
// kernel: tpu_custom_call.1
= control target key start
LH: loop header
LB: loop body
LE: loop exit
PB: predicated region body
PF: predicated region fallthrough
CT: control target
= control target key end

     0   :  { %9 = vsyncpa [#allocation3], 0  ;;  %s1232_s0 = inlined_call_operand.hbm [shape: f32[2,1,128], index: 0, kind: input, shape index: {}]   ;;  %s1233_s1 = inlined_call_operand.hbm [shape: bf16[2,128,128], index: 1, kind: input, shape index: {}]   ;;  %s1234_s2 = inlined_call_operand.hbm [shape: bf16[128,256], index: 2, kind: input, shape index: {}]   ;;  %s1235_s3 = inlined_call_operand.hbm [shape: f32[8,128], index: 3, kind: input, shape index: {}]   ;;  %s1236_s4 = inlined_call_operand.hbm [shape: f32[2,1,128], index: 4, kind: output, shape index: {}]  }
   0x1   :  { %10 = vsyncpa [#allocation6], 0 }
   0x2   :  { %11 = vsyncpa [#allocation9], 0  ;;  %s30_s17 = sshll.u32 %s1233_s1, 4  ;;  %s31_s17 = int_to_ptr.hbm [resolvable:$true] %s30_s17 }
   0x3   :  { %12 = vsyncpa [#allocation4], 0  ;;  %s1107_s18 = smov [#allocation5]   ;;  %s17_s22 = sshll.u32 %s1232_s0, 4  ;;  %s18_s22 = int_to_ptr.hbm [resolvable:$true] %s17_s22 }
   0x4   :  { %s32_s19 = sshll.u32 %s1107_s18, 4  ;;  %s1108_s23 = smov 64   ;;  %s33_s19 = int_to_ptr.vmem [resolvable:$true] %s32_s19 }
   0x5   :  { %s1109_s24 = smov 4   ;;  %s1110_s25 = smov [#allocation2]  }
   0x6   :  { %38 = dma.hbm_to_vmem [thread:$0]  %s31_s17, 2048, %s33_s19, [#allocation6], %s1108_s23, %s1108_s23, %s1109_s24  }
   0x7   :  { %s19_s26 = sshll.u32 %s1110_s25, 4  ;;  %s1111_s27 = smov 16   ;;  %s20_s26 = int_to_ptr.vmem [resolvable:$true] %s19_s26 }
   0x8   :  { %s1112_s28 = smov 1   ;;  %s43_s30 = sshll.u32 %s1234_s2, 4  ;;  %s44_s30 = int_to_ptr.hbm [resolvable:$true] %s43_s30 }
   0x9   :  { %25 = dma.hbm_to_vmem [thread:$0]  %s18_s22, 32, %s20_s26, [#allocation3], %s1111_s27, %s1111_s27, %s1112_s28  }
   0xa   :  { %s1113_s5 = smov [#allocation7]   ;;  %s57_s8 = sshll.u32 %s1235_s3, 4  ;;  %s58_s8 = int_to_ptr.hbm [resolvable:$true] %s57_s8 }
   0xb   :  { %s45_s0 = sshll.u32 %s1113_s5, 4  ;;  %s1114_s9 = smov 128   ;;  %s46_s0 = int_to_ptr.vmem [resolvable:$true] %s45_s0 }
   0xc   :  { %s1115_s10 = smov 8   ;;  %s1116_s11 = smov [#allocation8]  }
   0xd   :  { %51 = dma.hbm_to_vmem [thread:$0]  %s44_s30, 2048, %s46_s0, [#allocation6], %s1114_s9, %s1114_s9, %s1115_s10  }
   0xe   :  { %s59_s12 = sshll.u32 %s1116_s11, 4  ;;  %s60_s12 = int_to_ptr.vmem [resolvable:$true] %s59_s12 }
   0xf   :  { %62 = dma.hbm_to_vmem [thread:$0]  %s58_s8, 128, %s60_s12, [#allocation9]  }
  0x10   :  { %1099 = dma.done.wait [#allocation3], 32  }
  0x11   :  { %1100 = vsyncadd [#allocation3], 4294967264 }
  0x12   :  { %1101 = dma.done.wait [#allocation6], 4096  }
  0x13   :  { %1102 = vsyncadd [#allocation6], 4294963200 }
  0x14   :  { %1103 = dma.done.wait [#allocation9], 128  }
  0x15   :  { %1104 = vsyncadd [#allocation9], 4294967168  ;;  %v904_v0 = vld [vmem:[#allocation7 + $0x70] sm:$0xf]  ;;  %v941_v1 = vld [vmem:[#allocation7 + $0x74] sm:$0xf0] }
  0x16   :  { %v896_v2 = vld [vmem:[#allocation7 + $0x60] sm:$0xf]  ;;  %v905_v3 = vor.u32 %v941_v1, %v904_v0  ;;  %v939_v4 = vld [vmem:[#allocation7 + $0x64] sm:$0xf0]  ;;  %v888_v6 = vld [vmem:[#allocation7 + $0x50] sm:$0xf] }
  0x17   :  { %v897_v5 = vor.u32 %v939_v4, %v896_v2  ;;  %v937_v7 = vld [vmem:[#allocation7 + $0x54] sm:$0xf0]  ;;  %v880_v9 = vld [vmem:[#allocation7 + $0x40] sm:$0xf]  ;;  %v935_v10 = vld [vmem:[#allocation7 + $0x44] sm:$0xf0] }
  0x18   :  { %303 = vmatpush.bf16.msra.mxu0 %v905_v3  ;;  %942 = vmatpush.bf16.msra.mxu2 %v905_v3  ;;  %v889_v8 = vor.u32 %v937_v7, %v888_v6  ;;  %v881_v11 = vor.u32 %v935_v10, %v880_v9  ;;  %v872_v12 = vld [vmem:[#allocation7 + $0x30] sm:$0xf]  ;;  %v933_v13 = vld [vmem:[#allocation7 + $0x34] sm:$0xf0]  ;;  %v864_v15 = vld [vmem:[#allocation7 + $0x20] sm:$0xf] }
  0x19   :  { %v873_v14 = vor.u32 %v933_v13, %v872_v12  ;;  %v931_v16 = vld [vmem:[#allocation7 + $0x24] sm:$0xf0]  ;;  %v856_v18 = vld [vmem:[#allocation7 + $0x10] sm:$0xf]  ;;  %v929_v19 = vld [vmem:[#allocation7 + $0x14] sm:$0xf0] }
  0x1a   :  { %v865_v17 = vor.u32 %v931_v16, %v864_v15  ;;  %v857_v20 = vor.u32 %v929_v19, %v856_v18  ;;  %v848_v21 = vld [vmem:[#allocation7] sm:$0xf]  ;;  %v927_v22 = vld [vmem:[#allocation7 + $0x4] sm:$0xf0]  ;;  %v1164_v26 = vld [vmem:[#allocation5 + $0x10] sm:$0xff]  ;;  %s1117_s2 = smov [#allocation10]  }
  0x1b   :  { %v849_v23 = vor.u32 %v927_v22, %v848_v21  ;;  %v1158_v24 = vld [vmem:[#allocation5] sm:$0xff]  ;;  %v1161_v25 = vld [vmem:[#allocation5 + $0x8] sm:$0xff]  ;;  %v969_v29 = vld [vmem:[#allocation2] ss:$0 sm:$0xff]  ;;  %s765_s3 = sshll.u32 %s1117_s2, 4  ;;  %s767_s15 = sshll.u32 %s1236_s4, 4  ;;  %s766_s3 = int_to_ptr.vmem [resolvable:$true] %s765_s3  ;;  %s768_s15 = int_to_ptr.hbm [resolvable:$true] %s767_s15 }
  0x1c   :  { %304 = vmatpush.bf16.msra.mxu0 %v897_v5  ;;  %943 = vmatpush.bf16.msra.mxu2 %v897_v5  ;;  %v1167_v27 = vld [vmem:[#allocation5 + $0x68] sm:$0xff]  ;;  %v1169_v28 = vld [vmem:[#allocation8] sm:$0xff]  ;;  %v1173_v31 = vld [vmem:[#allocation5 + $0x18] sm:$0xff] }
  0x1d   :  { %v487_v30 = vmul.f32 %v969_v29, %v1169_v28  ;;  %v1176_v32 = vld [vmem:[#allocation5 + $0x70] sm:$0xff]  ;;  %v1179_v33 = vld [vmem:[#allocation5 + $0x20] sm:$0xff]  ;;  %v1182_v34 = vld [vmem:[#allocation5 + $0x78] sm:$0xff] }
  0x1e   :  { %v1185_v35 = vld [vmem:[#allocation5 + $0x28] sm:$0xff]  ;;  %v1188_v36 = vld [vmem:[#allocation5 + $0x30] sm:$0xff]  ;;  %v1191_v37 = vld [vmem:[#allocation5 + $0x38] sm:$0xff] }
  0x1f   :  { %v940_v44 = vld [vmem:[#allocation7 + $0x74] sm:$0xf]  ;;  %v906_v45 = vld [vmem:[#allocation7 + $0x78] sm:$0xf0]  ;;  %v938_v46 = vld [vmem:[#allocation7 + $0x64] sm:$0xf] }
  0x20   :  { %305 = vmatpush.bf16.msra.mxu0 %v889_v8  ;;  %944 = vmatpush.bf16.msra.mxu2 %v889_v8  ;;  %v909_v47 = vor.u32 %v940_v44, %v906_v45  ;;  %v898_v48 = vld [vmem:[#allocation7 + $0x68] sm:$0xf0]  ;;  %v936_v51 = vld [vmem:[#allocation7 + $0x54] sm:$0xf]  ;;  %v890_v52 = vld [vmem:[#allocation7 + $0x58] sm:$0xf0] }
  0x21   :  { %v901_v49 = vor.u32 %v938_v46, %v898_v48  ;;  %v934_v53 = vld [vmem:[#allocation7 + $0x44] sm:$0xf]  ;;  %v893_v54 = vor.u32 %v936_v51, %v890_v52  ;;  %v882_v55 = vld [vmem:[#allocation7 + $0x48] sm:$0xf0]  ;;  %v932_v58 = vld [vmem:[#allocation7 + $0x34] sm:$0xf] }
  0x22   :  { %392 = vmatpush.bf16.msra.mxu1 %v909_v47  ;;  %950 = vmatpush.bf16.msra.mxu3 %v909_v47  ;;  %v885_v56 = vor.u32 %v934_v53, %v882_v55  ;;  %v874_v59 = vld [vmem:[#allocation7 + $0x38] sm:$0xf0]  ;;  %v930_v60 = vld [vmem:[#allocation7 + $0x24] sm:$0xf]  ;;  %v866_v62 = vld [vmem:[#allocation7 + $0x28] sm:$0xf0] }
  0x23   :  { %v877_v61 = vor.u32 %v932_v58, %v874_v59  ;;  %v869_v63 = vor.u32 %v930_v60, %v866_v62  ;;  %v928_v1 = vld [vmem:[#allocation7 + $0x14] sm:$0xf]  ;;  %v858_v2 = vld [vmem:[#allocation7 + $0x18] sm:$0xf0]  ;;  %v926_v3 = vld [vmem:[#allocation7 + $0x4] sm:$0xf] }
  0x24   :  { %306 = vmatpush.bf16.msra.mxu0 %v881_v11  ;;  %945 = vmatpush.bf16.msra.mxu2 %v881_v11  ;;  %v861_v4 = vor.u32 %v928_v1, %v858_v2  ;;  %v850_v5 = vld [vmem:[#allocation7 + $0x8] sm:$0xf0]  ;;  %v920_v59 = vld [vmem:[#allocation5 + $0x50] sm:$0xff]  ;;  %v922_v62 = vld [vmem:[#allocation5 + $0x60] sm:$0xff] }
  0x25   :  { %v853_v6 = vor.u32 %v926_v3, %v850_v5  ;;  %v919_v55 = vld [vmem:[#allocation5 + $0x48] sm:$0xff] }
  0x26   :  { %393 = vmatpush.bf16.msra.mxu1 %v901_v49  ;;  %951 = vmatpush.bf16.msra.mxu3 %v901_v49 }
  0x28   :  { %307 = vmatpush.bf16.msra.mxu0 %v873_v14  ;;  %946 = vmatpush.bf16.msra.mxu2 %v873_v14 }
  0x2a   :  { %394 = vmatpush.bf16.msra.mxu1 %v893_v54  ;;  %952 = vmatpush.bf16.msra.mxu3 %v893_v54  ;;  %v918_v54 = vld [vmem:[#allocation5 + $0x40] sm:$0xff] }
  0x2c   :  { %308 = vmatpush.bf16.msra.mxu0 %v865_v17  ;;  %947 = vmatpush.bf16.msra.mxu2 %v865_v17 }
  0x2e   :  { %395 = vmatpush.bf16.msra.mxu1 %v885_v56  ;;  %953 = vmatpush.bf16.msra.mxu3 %v885_v56 }
  0x30   :  { %309 = vmatpush.bf16.msra.mxu0 %v857_v20  ;;  %948 = vmatpush.bf16.msra.mxu2 %v857_v20 }
  0x32   :  { %396 = vmatpush.bf16.msra.mxu1 %v877_v61  ;;  %954 = vmatpush.bf16.msra.mxu3 %v877_v61  ;;  %v921_v61 = vld [vmem:[#allocation5 + $0x58] sm:$0xff] }
  0x34   :  { %310 = vmatpush.bf16.msra.mxu0 %v849_v23  ;;  %949 = vmatpush.bf16.msra.mxu2 %v849_v23 }
  0x36   :  { %397 = vmatpush.bf16.msra.mxu1 %v869_v63  ;;  %955 = vmatpush.bf16.msra.mxu3 %v869_v63  ;;  %v970_v63 = vld [vmem:[#allocation2 + $0x1] ss:$0 sm:$0xff] }
  0x37   :  { %311 = vmatmul.bf16.vlgmr.msra.gmra.mxu0 %v1158_v24  ;;  %376 = vmatmul.bf16.vlgmr.msra.gmra.mxu2 %v1167_v27 }
  0x38   :  { %503 = vmatpush.xpose.msrb.mxu2 %v487_v30 }
  0x3a   :  { %398 = vmatpush.bf16.msra.mxu1 %v861_v4  ;;  %956 = vmatpush.bf16.msra.mxu3 %v861_v4 }
  0x3e   :  { %399 = vmatpush.bf16.msra.mxu1 %v853_v6  ;;  %957 = vmatpush.bf16.msra.mxu3 %v853_v6 }
  0x41   :  { %400 = vmatmul.bf16.vlgmr.msra.gmra.mxu1 %v1158_v24  ;;  %465 = vmatmul.bf16.vlgmr.msra.gmra.mxu3 %v1167_v27 }
  0x47   :  { %316 = vmatmul.bf16.gmra.mxu0 %v1161_v25  ;;  %381 = vmatmul.bf16.gmra.mxu2 %v1176_v32 }
  0x51   :  { %405 = vmatmul.bf16.gmra.mxu1 %v1161_v25  ;;  %470 = vmatmul.bf16.gmra.mxu3 %v1176_v32 }
  0x57   :  { %321 = vmatmul.bf16.gmra.mxu0 %v1164_v26  ;;  %386 = vmatmul.bf16.gmra.mxu2 %v1182_v34 }
  0x61   :  { %410 = vmatmul.bf16.gmra.mxu1 %v1164_v26  ;;  %475 = vmatmul.bf16.gmra.mxu3 %v1182_v34 }
  0x67   :  { %326 = vmatmul.bf16.gmra.mxu0 %v1173_v31 }
  0x71   :  { %415 = vmatmul.bf16.gmra.mxu1 %v1173_v31 }
  0x77   :  { %331 = vmatmul.bf16.gmra.mxu0 %v1179_v33 }
  0x81   :  { %420 = vmatmul.bf16.gmra.mxu1 %v1179_v33 }
  0x87   :  { %336 = vmatmul.bf16.gmra.mxu0 %v1185_v35 }
  0x91   :  { %425 = vmatmul.bf16.gmra.mxu1 %v1185_v35 }
  0x97   :  { %341 = vmatmul.bf16.gmra.mxu0 %v1188_v36 }
  0xa1   :  { %430 = vmatmul.bf16.gmra.mxu1 %v1188_v36 }
  0xa7   :  { %346 = vmatmul.bf16.gmra.mxu0 %v1191_v37 }
  0xb1   :  { %435 = vmatmul.bf16.gmra.mxu1 %v1191_v37 }
  0xb4   :  { %v312_v38 = vpop.f32.mrf.mxu0 }
  0xb5   :  { %504 = vmatmul.f32.vlgmr.msrb.gmra.mxu2 %v312_v38 }
  0xb7   :  { %351 = vmatmul.bf16.gmra.mxu0 %v918_v54 }
  0xba   :  { %v1194_v8 = vpop.f32.mrf.mxu2 }
  0xbc   :  { %v314_v39 = vpop.f32.mrf.mxu0 }
  0xbd   :  { %507 = vmatmul.f32.gmra.mxu2 %v314_v39 }
  0xbe   :  { %v401_v30 = vpop.f32.mrf.mxu1 }
  0xc1   :  { %440 = vmatmul.bf16.gmra.mxu1 %v918_v54 }
  0xc2   :  { %v1198_v10 = vpop.f32.mrf.mxu2 }
  0xc4   :  { %v317_v40 = vpop.f32.mrf.mxu0  ;;  %v466_v6 = vpop.f32.mrf.mxu3 }
  0xc5   :  { %510 = vmatmul.f32.gmra.mxu2 %v317_v40 }
  0xc6   :  { %v403_v32 = vpop.f32.mrf.mxu1 }
  0xc7   :  { %356 = vmatmul.bf16.gmra.mxu0 %v919_v55 }
  0xca   :  { %v1202_v12 = vpop.f32.mrf.mxu2 }
  0xcc   :  { %v319_v41 = vpop.f32.mrf.mxu0 }
  0xcd   :  { %513 = vmatmul.f32.gmra.mxu2 %v319_v41 }
  0xce   :  { %v406_v34 = vpop.f32.mrf.mxu1 }
  0xd1   :  { %445 = vmatmul.bf16.gmra.mxu1 %v919_v55 }
  0xd2   :  { %v1204_v14 = vpop.f32.mrf.mxu2 }
  0xd4   :  { %v322_v42 = vpop.f32.mrf.mxu0 }
  0xd5   :  { %516 = vmatmul.f32.gmra.mxu2 %v322_v42 }
  0xd6   :  { %v408_v36 = vpop.f32.mrf.mxu1 }
  0xd7   :  { %361 = vmatmul.bf16.gmra.mxu0 %v920_v59 }
  0xda   :  { %v1208_v17 = vpop.f32.mrf.mxu2 }
  0xdc   :  { %v324_v43 = vpop.f32.mrf.mxu0 }
  0xdd   :  { %519 = vmatmul.f32.gmra.mxu2 %v324_v43 }
  0xde   :  { %v411_v39 = vpop.f32.mrf.mxu1 }
  0xe1   :  { %450 = vmatmul.bf16.gmra.mxu1 %v920_v59 }
  0xe2   :  { %v1211_v19 = vpop.f32.mrf.mxu2 }
  0xe4   :  { %v327_v50 = vpop.f32.mrf.mxu0 }
  0xe5   :  { %522 = vmatmul.f32.gmra.mxu2 %v327_v50 }
  0xe6   :  { %v413_v37 = vpop.f32.mrf.mxu1 }
  0xe7   :  { %366 = vmatmul.bf16.gmra.mxu0 %v921_v61 }
  0xec   :  { %v329_v57 = vpop.f32.mrf.mxu0 }
  0xed   :  { %525 = vmatmul.f32.gmra.mxu2 %v329_v57 }
  0xee   :  { %v416_v42 = vpop.f32.mrf.mxu1 }
  0xf1   :  { %455 = vmatmul.bf16.gmra.mxu1 %v921_v61 }
  0xf4   :  { %v332_v0 = vpop.f32.mrf.mxu0 }
  0xf5   :  { %528 = vmatmul.f32.gmra.mxu2 %v332_v0  ;;  %v625_v0 = vmul.f32 %v970_v63, %v1169_v28 }
  0xf6   :  { %v418_v44 = vpop.f32.mrf.mxu1 }
  0xf7   :  { %371 = vmatmul.bf16.gmra.mxu0 %v922_v62 }
  0xfc   :  { %v334_v7 = vpop.f32.mrf.mxu0 }
  0xfd   :  { %531 = vmatmul.f32.gmra.mxu2 %v334_v7  ;;  %v468_v7 = vpop.f32.mrf.mxu3 }
  0xfe   :  { %v421_v45 = vpop.f32.mrf.mxu1 }
 0x101   :  { %460 = vmatmul.bf16.gmra.mxu1 %v922_v62 }
 0x104   :  { %v337_v9 = vpop.f32.mrf.mxu0 }
 0x105   :  { %534 = vmatmul.f32.gmra.mxu2 %v337_v9 }
 0x106   :  { %v423_v46 = vpop.f32.mrf.mxu1 }
 0x10c   :  { %v339_v11 = vpop.f32.mrf.mxu0 }
 0x10d   :  { %537 = vmatmul.f32.gmra.mxu2 %v339_v11  ;;  %v471_v11 = vpop.f32.mrf.mxu3 }
 0x10e   :  { %v426_v47 = vpop.f32.mrf.mxu1 }
 0x114   :  { %v342_v13 = vpop.f32.mrf.mxu0 }
 0x115   :  { %540 = vmatmul.f32.gmra.mxu2 %v342_v13 }
 0x116   :  { %v428_v48 = vpop.f32.mrf.mxu1 }
 0x11c   :  { %v344_v15 = vpop.f32.mrf.mxu0 }
 0x11d   :  { %543 = vmatmul.f32.gmra.mxu2 %v344_v15  ;;  %v473_v15 = vpop.f32.mrf.mxu3 }
 0x11e   :  { %v431_v49 = vpop.f32.mrf.mxu1 }
 0x124   :  { %v347_v16 = vpop.f32.mrf.mxu0 }
 0x125   :  { %546 = vmatmul.f32.gmra.mxu2 %v347_v16 }
 0x126   :  { %v433_v51 = vpop.f32.mrf.mxu1 }
 0x12c   :  { %v349_v18 = vpop.f32.mrf.mxu0 }
 0x12d   :  { %549 = vmatmul.f32.gmra.mxu2 %v349_v18  ;;  %v476_v18 = vpop.f32.mrf.mxu3 }
 0x12e   :  { %v436_v52 = vpop.f32.mrf.mxu1 }
 0x134   :  { %v352_v1 = vpop.f32.mrf.mxu0 }
 0x136   :  { %v438_v53 = vpop.f32.mrf.mxu1 }
 0x137   :  { %594 = vmatpush.msrb.mxu3 %v438_v53 }
 0x138   :  { %v505_v20 = vpop.f32.mrf.mxu2 }
 0x139   :  { %553 = vxpose.xlu0.b32.start [1/16] (narrow) %v505_v20, 8  ;;  %595 = vmatpush.msrb.mxu3 %v436_v52 }
 0x13b   :  { %596 = vmatpush.msrb.mxu3 %v433_v51 }
 0x13c   :  { %v354_v5 = vpop.f32.mrf.mxu0 }
 0x13d   :  { %597 = vmatpush.msrb.mxu3 %v431_v49 }
 0x13f   :  { %598 = vmatpush.msrb.mxu3 %v428_v48 }
 0x140   :  { %v508_v21 = vpop.f32.mrf.mxu2 }
 0x141   :  { %554 = vxpose.xlu0.b32.cont [2/16] (narrow) %v508_v21, 8  ;;  %599 = vmatpush.msrb.mxu3 %v426_v47  ;;  %v478_v21 = vpop.f32.mrf.mxu3 }
 0x142   :  { %732 = vmatpush.msra.mxu2 %v478_v21 }
 0x143   :  { %600 = vmatpush.msrb.mxu3 %v423_v46 }
 0x144   :  { %v357_v9 = vpop.f32.mrf.mxu0  ;;  %733 = vmatpush.msra.mxu2 %v476_v18 }
 0x145   :  { %601 = vmatpush.msrb.mxu3 %v421_v45  ;;  %v441_v45 = vpop.f32.mrf.mxu1 }
 0x146   :  { %734 = vmatpush.msra.mxu2 %v473_v15 }
 0x147   :  { %602 = vmatpush.msrb.mxu3 %v418_v44 }
 0x148   :  { %v511_v22 = vpop.f32.mrf.mxu2  ;;  %735 = vmatpush.msra.mxu2 %v471_v11 }
 0x149   :  { %555 = vxpose.xlu0.b32.cont [3/16] (narrow) %v511_v22, 8  ;;  %603 = vmatpush.msrb.mxu3 %v416_v42 }
 0x14a   :  { %736 = vmatpush.msra.mxu2 %v468_v7 }
 0x14b   :  { %604 = vmatpush.msrb.mxu3 %v413_v37 }
 0x14c   :  { %v359_v13 = vpop.f32.mrf.mxu0  ;;  %737 = vmatpush.msra.mxu2 %v466_v6 }
 0x14d   :  { %605 = vmatpush.msrb.mxu3 %v411_v39  ;;  %v443_v46 = vpop.f32.mrf.mxu1 }
 0x14f   :  { %606 = vmatpush.msrb.mxu3 %v408_v36 }
 0x150   :  { %v514_v23 = vpop.f32.mrf.mxu2 }
 0x151   :  { %556 = vxpose.xlu0.b32.cont [4/16] (narrow) %v514_v23, 8  ;;  %607 = vmatpush.msrb.mxu3 %v406_v34 }
 0x153   :  { %608 = vmatpush.msrb.mxu3 %v403_v32 }
 0x154   :  { %v362_v16 = vpop.f32.mrf.mxu0 }
 0x155   :  { %609 = vmatpush.msrb.mxu3 %v401_v30  ;;  %v446_v47 = vpop.f32.mrf.mxu1 }
 0x157   :  { %641 = vmatpush.xpose.msra.mxu3 %v625_v0 }
 0x158   :  { %v517_v24 = vpop.f32.mrf.mxu2 }
 0x159   :  { %557 = vxpose.xlu0.b32.cont [5/16] (narrow) %v517_v24, 8 }
 0x15c   :  { %v364_v20 = vpop.f32.mrf.mxu0 }
 0x15d   :  { %v448_v48 = vpop.f32.mrf.mxu1 }
 0x160   :  { %v520_v25 = vpop.f32.mrf.mxu2 }
 0x161   :  { %558 = vxpose.xlu0.b32.cont [6/16] (narrow) %v520_v25, 8 }
 0x164   :  { %v367_v22 = vpop.f32.mrf.mxu0 }
 0x168   :  { %v523_v26 = vpop.f32.mrf.mxu2 }
 0x169   :  { %559 = vxpose.xlu0.b32.cont [7/16] (narrow) %v523_v26, 8 }
 0x16c   :  { %v369_v23 = vpop.f32.mrf.mxu0 }
 0x170   :  { %v526_v27 = vpop.f32.mrf.mxu2 }
 0x171   :  { %560 = vxpose.xlu0.b32.cont [8/16] (narrow) %v526_v27, 8 }
 0x174   :  { %v372_v24 = vpop.f32.mrf.mxu0 }
 0x178   :  { %v529_v29 = vpop.f32.mrf.mxu2 }
 0x179   :  { %561 = vxpose.xlu0.b32.cont [9/16] (narrow) %v529_v29, 8 }
 0x17c   :  { %v374_v25 = vpop.f32.mrf.mxu0 }
 0x180   :  { %v532_v31 = vpop.f32.mrf.mxu2 }
 0x181   :  { %562 = vxpose.xlu0.b32.cont [10/16] (narrow) %v532_v31, 8 }
 0x188   :  { %v535_v33 = vpop.f32.mrf.mxu2 }
 0x189   :  { %563 = vxpose.xlu0.b32.cont [11/16] (narrow) %v535_v33, 8 }
 0x190   :  { %v538_v35 = vpop.f32.mrf.mxu2 }
 0x191   :  { %564 = vxpose.xlu0.b32.cont [12/16] (narrow) %v538_v35, 8 }
 0x198   :  { %v541_v38 = vpop.f32.mrf.mxu2 }
 0x199   :  { %565 = vxpose.xlu0.b32.cont [13/16] (narrow) %v541_v38, 8 }
 0x1a0   :  { %v544_v40 = vpop.f32.mrf.mxu2 }
 0x1a1   :  { %566 = vxpose.xlu0.b32.cont [14/16] (narrow) %v544_v40, 8 }
 0x1a8   :  { %v547_v41 = vpop.f32.mrf.mxu2 }
 0x1a9   :  { %567 = vxpose.xlu0.b32.cont [15/16] (narrow) %v547_v41, 8 }
 0x1b0   :  { %v550_v43 = vpop.f32.mrf.mxu2 }
 0x1b1   :  { %568 = vxpose.xlu0.b32.end [16/16] (narrow) %v550_v43, 8 }
 0x1dd   :  { %v569_v50 = vpop.trf.xlu0 }
 0x1de   :  { %585 = vmax.xlane.f32.xlu1 %v569_v50 }
 0x251   :  { %v586_v56 = vpop.xlane.xlu1 %585 }
 0x252   :  { %v587_v57 = vsub.f32 %v569_v50, %v586_v56  ;;  %v451_v50 = vpop.f32.mrf.mxu1 }
 0x254   :  { %v588_v58 = vmul.f32 1.442695, %v587_v57 }
 0x256   :  { %971 = vpow2.f32 %v588_v58 }
 0x25a   :  { %v453_v51 = vpop.f32.mrf.mxu1 }
 0x25c   :  { %v972_v60 = vpop.eup %971 }
 0x25d   :  { %590 = vadd.xlane.f32.xlu1 %v972_v60 }
 0x262   :  { %v456_v52 = vpop.f32.mrf.mxu1 }
 0x26a   :  { %v458_v53 = vpop.f32.mrf.mxu1 }
 0x272   :  { %v461_v54 = vpop.f32.mrf.mxu1 }
 0x27a   :  { %v463_v55 = vpop.f32.mrf.mxu1 }
 0x27b   :  { %738 = vmatpush.msra.mxu2 %v463_v55 }
 0x27d   :  { %739 = vmatpush.msra.mxu2 %v461_v54 }
 0x27f   :  { %740 = vmatpush.msra.mxu2 %v458_v53 }
 0x281   :  { %741 = vmatpush.msra.mxu2 %v456_v52 }
 0x283   :  { %742 = vmatpush.msra.mxu2 %v453_v51 }
 0x285   :  { %743 = vmatpush.msra.mxu2 %v451_v50 }
 0x287   :  { %744 = vmatpush.msra.mxu2 %v448_v48 }
 0x289   :  { %745 = vmatpush.msra.mxu2 %v446_v47 }
 0x28b   :  { %746 = vmatpush.msra.mxu2 %v443_v46 }
 0x28d   :  { %747 = vmatpush.msra.mxu2 %v441_v45 }
 0x2d0   :  { %v591_v2 = vpop.xlane.xlu1 %590 }
 0x2d1   :  { %973 = vrcp.f32 %v591_v2 }
 0x2d7   :  { %v974_v3 = vpop.eup %973 }
 0x2d8   :  { %v593_v4 = vmul.f32 %v974_v3, %v972_v60 }
 0x2da   :  { %610 = vmatmul.f32.vlgmr.msrb.gmra.mxu3 %v593_v4 }
 0x2e2   :  { %642 = vmatmul.f32.vlgmr.msra.gmra.mxu3 %v352_v1 }
 0x2ea   :  { %645 = vmatmul.f32.gmra.mxu3 %v354_v5 }
 0x2f2   :  { %648 = vmatmul.f32.gmra.mxu3 %v357_v9 }
 0x2fa   :  { %651 = vmatmul.f32.gmra.mxu3 %v359_v13 }
 0x302   :  { %654 = vmatmul.f32.gmra.mxu3 %v362_v16 }
 0x30a   :  { %657 = vmatmul.f32.gmra.mxu3 %v364_v20 }
 0x312   :  { %660 = vmatmul.f32.gmra.mxu3 %v367_v22 }
 0x31a   :  { %663 = vmatmul.f32.gmra.mxu3 %v369_v23 }
 0x322   :  { %666 = vmatmul.f32.gmra.mxu3 %v372_v24 }
 0x32a   :  { %669 = vmatmul.f32.gmra.mxu3 %v374_v25 }
 0x332   :  { %672 = vmatmul.f32.gmra.mxu3 %v1194_v8 }
 0x33a   :  { %675 = vmatmul.f32.gmra.mxu3 %v1198_v10 }
 0x342   :  { %678 = vmatmul.f32.gmra.mxu3 %v1202_v12 }
 0x34a   :  { %681 = vmatmul.f32.gmra.mxu3 %v1204_v14 }
 0x352   :  { %684 = vmatmul.f32.gmra.mxu3 %v1208_v17 }
 0x35a   :  { %687 = vmatmul.f32.gmra.mxu3 %v1211_v19 }
 0x35d   :  { %v611_v26 = vpop.f32.mrf.mxu3 }
 0x35e   :  { %v614_v27 = vmul.f32 %v611_v26, %v1169_v28 }
 0x360   :  { %v615_v29 = vrot.slane %v614_v27, 4 }
 0x362   :  { %v616_v30 = vadd.f32 %v615_v29, %v614_v27 }
 0x364   :  { %v617_v31 = vrot.slane %v616_v30, 2 }
 0x365   :  { %v643_v32 = vpop.f32.mrf.mxu3 }
 0x366   :  { %v618_v33 = vadd.f32 %v617_v31, %v616_v30  ;;  %691 = vxpose.xlu2.b32.start [1/16] (narrow) %v643_v32, 8 }
 0x368   :  { %v619_v8 = vrot.slane %v618_v33, 1 }
 0x36a   :  { %v620_v34 = vadd.f32 %v619_v8, %v618_v33 }
 0x36c   :  { %621 = vst [vmem:[#allocation10] sm:$0x1] %v620_v34 }
 0x36d   :  { %v646_v10 = vpop.f32.mrf.mxu3 }
 0x36e   :  { %692 = vxpose.xlu2.b32.cont [2/16] (narrow) %v646_v10, 8 }
 0x375   :  { %v649_v12 = vpop.f32.mrf.mxu3 }
 0x376   :  { %693 = vxpose.xlu2.b32.cont [3/16] (narrow) %v649_v12, 8 }
 0x37d   :  { %v652_v14 = vpop.f32.mrf.mxu3 }
 0x37e   :  { %694 = vxpose.xlu2.b32.cont [4/16] (narrow) %v652_v14, 8 }
 0x385   :  { %v655_v17 = vpop.f32.mrf.mxu3 }
 0x386   :  { %695 = vxpose.xlu2.b32.cont [5/16] (narrow) %v655_v17, 8 }
 0x38d   :  { %v658_v19 = vpop.f32.mrf.mxu3 }
 0x38e   :  { %696 = vxpose.xlu2.b32.cont [6/16] (narrow) %v658_v19, 8 }
 0x395   :  { %v661_v35 = vpop.f32.mrf.mxu3 }
 0x396   :  { %697 = vxpose.xlu2.b32.cont [7/16] (narrow) %v661_v35, 8 }
 0x39d   :  { %v664_v36 = vpop.f32.mrf.mxu3 }
 0x39e   :  { %698 = vxpose.xlu2.b32.cont [8/16] (narrow) %v664_v36, 8 }
 0x3a5   :  { %v667_v38 = vpop.f32.mrf.mxu3 }
 0x3a6   :  { %699 = vxpose.xlu2.b32.cont [9/16] (narrow) %v667_v38, 8 }
 0x3ad   :  { %v670_v39 = vpop.f32.mrf.mxu3 }
 0x3ae   :  { %700 = vxpose.xlu2.b32.cont [10/16] (narrow) %v670_v39, 8 }
 0x3b5   :  { %v673_v40 = vpop.f32.mrf.mxu3 }
 0x3b6   :  { %701 = vxpose.xlu2.b32.cont [11/16] (narrow) %v673_v40, 8 }
 0x3bd   :  { %v676_v37 = vpop.f32.mrf.mxu3 }
 0x3be   :  { %702 = vxpose.xlu2.b32.cont [12/16] (narrow) %v676_v37, 8 }
 0x3c5   :  { %v679_v41 = vpop.f32.mrf.mxu3 }
 0x3c6   :  { %703 = vxpose.xlu2.b32.cont [13/16] (narrow) %v679_v41, 8 }
 0x3cd   :  { %v682_v42 = vpop.f32.mrf.mxu3 }
 0x3ce   :  { %704 = vxpose.xlu2.b32.cont [14/16] (narrow) %v682_v42, 8 }
 0x3d5   :  { %v685_v43 = vpop.f32.mrf.mxu3 }
 0x3d6   :  { %705 = vxpose.xlu2.b32.cont [15/16] (narrow) %v685_v43, 8 }
 0x3dd   :  { %v688_v44 = vpop.f32.mrf.mxu3 }
 0x3de   :  { %706 = vxpose.xlu2.b32.end [16/16] (narrow) %v688_v44, 8 }
 0x3ff   :  { %v707_v49 = vpop.trf.xlu2 }
 0x400   :  { %723 = vmax.xlane.f32.xlu1 %v707_v49 }
 0x473   :  { %v724_v56 = vpop.xlane.xlu1 %723 }
 0x474   :  { %v725_v57 = vsub.f32 %v707_v49, %v724_v56 }
 0x476   :  { %v726_v58 = vmul.f32 1.442695, %v725_v57 }
 0x478   :  { %975 = vpow2.f32 %v726_v58 }
 0x47e   :  { %v976_v59 = vpop.eup %975 }
 0x47f   :  { %728 = vadd.xlane.f32.xlu1 %v976_v59 }
 0x4f2   :  { %v729_v60 = vpop.xlane.xlu1 %728 }
 0x4f3   :  { %977 = vrcp.f32 %v729_v60 }
 0x4f9   :  { %v978_v61 = vpop.eup %977 }
 0x4fa   :  { %v731_v62 = vmul.f32 %v978_v61, %v976_v59 }
 0x4fc   :  { %748 = vmatmul.f32.vlgmr.msra.gmra.mxu2 %v731_v62 }
 0x57f   :  { %v749_v63 = vpop.f32.mrf.mxu2 }
 0x580   :  { %v752_v0 = vmul.f32 %v749_v63, %v1169_v28 }
 0x582   :  { %v753_v1 = vrot.slane %v752_v0, 4 }
 0x584   :  { %v754_v2 = vadd.f32 %v753_v1, %v752_v0 }
 0x586   :  { %v755_v3 = vrot.slane %v754_v2, 2 }
 0x588   :  { %v756_v4 = vadd.f32 %v755_v3, %v754_v2 }
 0x58a   :  { %v757_v5 = vrot.slane %v756_v4, 1 }
 0x58c   :  { %v758_v6 = vadd.f32 %v757_v5, %v756_v4 }
 0x58e   :  { %760 = vst [vmem:[#allocation10 + $0x1] sm:$0x1] %v758_v6 }
 0x58f   :  { %773 = dma.vmem_to_hbm [thread:$0]  %s766_s3, 32, %s768_s15, [#allocation4], %s1111_s27, %s1111_s27, %s1112_s28  }
 0x590   :  { %1105 = dma.done.wait [#allocation4], 32  }
 0x591   :  { %1106 = vsyncadd [#allocation4], 4294967264 }
 0x592   :  { %778 = vsyncpa [#allocation3], 1 }
 0x593   :  { %779 = vsyncpa [#allocation6], 1 }
 0x594   :  { %780 = vsyncpa [#allocation9], 1 }
 0x595   :  { %781 = vsyncpa [#allocation4], 1 }

</bundles_post_ra>
